<compile_context>
chip_gen: v5e
topology: v5e:2x2
jax: 0.10.0
libtpu: 0.0.40
codegen_flags: <defaults>
</compile_context>

<pallas_src>
import functools

import jax
import jax.numpy as jnp
from jax.experimental import pallas as pl
from jax.experimental.pallas import tpu as pltpu


def _binary_head_kernel(x_ref, w_ref, b_ref, o_ref, xn_ref, *, s):
    # x_ref : (tm, E)  batch tile of embeddings (same block for every class tile)
    # w_ref : (E, tn)  weight column tile
    # b_ref : (1, tn)  bias tile
    # o_ref : (tm, tn) output tile
    # xn_ref: (tm, E)  VMEM scratch holding s * l2_normalize(x), reused across
    #                  the inner (class) grid axis.

    # Hoisted normalization: only at the first class tile of each batch tile.
    @pl.when(pl.program_id(1) == 0)
    def _():
        x = x_ref[...].astype(jnp.float32)
        sum_sq = jnp.sum(x * x, axis=1, keepdims=True)
        # rsqrt (EUP) instead of sqrt + divide; scale s folded into the
        # normalization so no per-step B x tn multiply is needed.
        # NOTE: an all-zero row yields inf/NaN, matching the PyTorch reference.
        inv = jax.lax.rsqrt(sum_sq) * s
        xn_ref[...] = (x * inv).astype(xn_ref.dtype)

    # Matmul in the native input dtype (bf16 stays bf16) with f32 accumulation.
    acc = jnp.dot(xn_ref[...], w_ref[...], preferred_element_type=jnp.float32)
    # Bias must be scaled by s too (logit = s * (x_n @ W + b)); 1 x tn is cheap.
    acc = acc + b_ref[...].astype(jnp.float32) * s
    o_ref[...] = acc.astype(o_ref.dtype)


def binary_head(x, w, b, *, s=16.0, tm=256, tn=512):
    """x: (B, E), w: (E, C), b: (C,) -> logits (B, C) = s * (l2_norm(x) @ w + b)."""
    B, E = x.shape
    E2, C = w.shape
    assert E == E2 and b.shape == (C,)

    # Clamp tiles to the problem size; for tiny shapes this collapses the grid
    # to a single block (no pipeline overhead).
    tm = min(tm, B)
    tn = min(tn, C)

    # Pad batch / class dims so the grid divides evenly.  Padded rows use 1.0
    # (so no NaNs from a zero norm); padded columns use zero weights/bias.
    # Both are sliced away from the result.
    Bp = -(-B // tm) * tm
    Cp = -(-C // tn) * tn
    xp = x if Bp == B else jnp.pad(x, ((0, Bp - B), (0, 0)), constant_values=1.0)
    wp = w if Cp == C else jnp.pad(w, ((0, 0), (0, Cp - C)))
    bp = b if Cp == C else jnp.pad(b, (0, Cp - C))
    b2d = bp.reshape(1, Cp)

    # VMEM budget: double-buffered x / w / bias / out tiles + the x_n scratch.
    def _isz(a):
        return jnp.dtype(a.dtype).itemsize

    need = (2 * tm * E * _isz(x)       # x tiles (double buffered)
            + 2 * E * tn * _isz(w)     # weight tiles
            + 2 * 8 * tn * _isz(b)     # bias tiles (sublane-padded)
            + 2 * tm * tn * _isz(x)    # output tiles
            + tm * E * _isz(x))        # hoisted x_n scratch
    vmem_limit = int(min(max(2 * need, 8 << 20), 64 << 20))

    kernel = functools.partial(_binary_head_kernel, s=float(s))

    out = pl.pallas_call(
        kernel,
        out_shape=jax.ShapeDtypeStruct((Bp, Cp), x.dtype),
        grid_spec=pltpu.PrefetchScalarGridSpec(
            num_scalar_prefetch=0,
            grid=(Bp // tm, Cp // tn),
            in_specs=[
                pl.BlockSpec((tm, E), lambda i, c: (i, 0)),   # x batch tile (reused over c)
                pl.BlockSpec((E, tn), lambda i, c: (0, c)),   # weight column tile
                pl.BlockSpec((1, tn), lambda i, c: (0, c)),   # bias tile
            ],
            out_specs=pl.BlockSpec((tm, tn), lambda i, c: (i, c)),
            scratch_shapes=[pltpu.VMEM((tm, E), x.dtype)],    # hoisted s * l2_norm(x)
        ),
        compiler_params=pltpu.CompilerParams(
            dimension_semantics=("parallel", "arbitrary"),
            vmem_limit_bytes=vmem_limit,
        ),
    )(xp, wp, b2d)

    return out[:B, :C]


def _reference(x, w, b, s):
    xf = x.astype(jnp.float32)
    norm = jnp.sqrt(jnp.sum(xf * xf, axis=1, keepdims=True))
    xn = xf / norm
    return (xn @ w.astype(jnp.float32) + b.astype(jnp.float32)) * s


if __name__ == "__main__":
    # Small shapes consistent with the module: emb_size=128, num_class=256, batch=8.
    B, E, C = 8, 128, 256
    s = 16.0

    key = jax.random.PRNGKey(0)
    kx, kw, kb = jax.random.split(key, 3)

    x = jax.random.normal(kx, (B, E), dtype=jnp.float32)

    # Deterministic init mimicking nn.Linear: U(-1/sqrt(E), 1/sqrt(E)).
    bound = 1.0 / (E ** 0.5)
    # PyTorch stores weight as (C, E); we store the transpose (E, C) for the kernel.
    w = jax.random.uniform(kw, (E, C), dtype=jnp.float32, minval=-bound, maxval=bound)
    b = jax.random.uniform(kb, (C,), dtype=jnp.float32, minval=-bound, maxval=bound)

    # Single-block path (grid collapses to (1, 1) at this toy size).
    out = binary_head(x, w, b, s=s)
    out = jax.block_until_ready(out)
    ref = _reference(x, w, b, s)
    assert out.shape == (B, C)
    assert jnp.allclose(out, ref, atol=1e-4, rtol=1e-4), "mismatch vs reference"

    # Multi-tile path: exercises the hoisted-normalization scratch across a
    # (2, 2) grid (batch tiled by 8, classes tiled by 128).
    x2 = jax.random.normal(jax.random.PRNGKey(1), (16, E), dtype=jnp.float32)
    out2 = jax.block_until_ready(binary_head(x2, w, b, s=s, tm=8, tn=128))
    ref2 = _reference(x2, w, b, s)
    assert jnp.allclose(out2, ref2, atol=1e-4, rtol=1e-4), "mismatch (tiled) vs reference"

    print("KERNEL_OK")
</pallas_src>

<mosaic_0001>
module attributes {stable_mosaic.version = 11 : i64} {
  func.func @_binary_head_kernel(%arg0: i32, %arg1: i32, %arg2: memref<8x128xf32, #tpu.memory_space<vmem>>, %arg3: memref<128x256xf32, #tpu.memory_space<vmem>>, %arg4: memref<1x256xf32, #tpu.memory_space<vmem>>, %arg5: memref<8x256xf32, #tpu.memory_space<vmem>>, %arg6: memref<8x128xf32, #tpu.memory_space<vmem>>) attributes {dimension_semantics = [#tpu.dimension_semantics<parallel>, #tpu.dimension_semantics<arbitrary>], iteration_bounds = array<i64: 1, 1>, scalar_prefetch = 0 : i64, scratch_operands = 1 : i64, tpu.core_type = #tpu.core_type<tc>, window_params = [{transform_indices = @transform_0, window_bounds = array<i64: 8, 128>}, {transform_indices = @transform_1, window_bounds = array<i64: 128, 256>}, {transform_indices = @transform_2, window_bounds = array<i64: 1, 256>}, {transform_indices = @transform_3, window_bounds = array<i64: 8, 256>}]} {
    %c0_i32 = arith.constant 0 : i32
    %0 = arith.cmpi eq, %arg1, %c0_i32 : i32
    %1 = arith.extui %0 : i1 to i32
    %c0_i32_0 = arith.constant 0 : i32
    %2 = arith.cmpi ne, %1, %c0_i32_0 : i32
    scf.if %2 {
      %c0_9 = arith.constant 0 : index
      %c0_10 = arith.constant 0 : index
      %12 = vector.load %arg2[%c0_9, %c0_10] : memref<8x128xf32, #tpu.memory_space<vmem>>, vector<8x128xf32>
      %13 = arith.mulf %12, %12 : vector<8x128xf32>
      %cst_11 = arith.constant dense<0.000000e+00> : vector<8xf32>
      %14 = vector.multi_reduction <add>, %13, %cst_11 [1] : vector<8x128xf32> to vector<8xf32>
      %15 = vector.shape_cast %14 : vector<8xf32> to vector<8x1xf32>
      %16 = math.rsqrt %15 : vector<8x1xf32>
      %cst_12 = arith.constant 1.600000e+01 : f32
      %17 = vector.broadcast %cst_12 : f32 to vector<8x1xf32>
      %18 = arith.mulf %16, %17 : vector<8x1xf32>
      %19 = vector.broadcast %18 : vector<8x1xf32> to vector<8x128xf32>
      %20 = arith.mulf %12, %19 : vector<8x128xf32>
      %c0_13 = arith.constant 0 : index
      %c0_14 = arith.constant 0 : index
      %21 = vector.load %arg6[%c0_13, %c0_14] : memref<8x128xf32, #tpu.memory_space<vmem>>, vector<8x128xf32>
      tpu.vector_store %arg6[%c0_13, %c0_14], %20 {strides = array<i32>} : memref<8x128xf32, #tpu.memory_space<vmem>>, vector<8x128xf32>,
    } else {
    }
    %c0 = arith.constant 0 : index
    %c0_1 = arith.constant 0 : index
    %3 = vector.load %arg6[%c0, %c0_1] : memref<8x128xf32, #tpu.memory_space<vmem>>, vector<8x128xf32>
    %c0_2 = arith.constant 0 : index
    %c0_3 = arith.constant 0 : index
    %4 = vector.load %arg3[%c0_2, %c0_3] : memref<128x256xf32, #tpu.memory_space<vmem>>, vector<128x256xf32>
    %cst = arith.constant dense<0.000000e+00> : vector<8x256xf32>
    %5 = tpu.matmul %3, %4, %cst {dimension_numbers = #tpu.dot_dimension_numbers<[1], [0], [0], [1], [0, 0, 1, 1], [], []>} : vector<8x128xf32>, vector<128x256xf32>, vector<8x256xf32> -> vector<8x256xf32>
    %c0_4 = arith.constant 0 : index
    %c0_5 = arith.constant 0 : index
    %6 = vector.load %arg4[%c0_4, %c0_5] : memref<1x256xf32, #tpu.memory_space<vmem>>, vector<1x256xf32>
    %cst_6 = arith.constant 1.600000e+01 : f32
    %7 = vector.broadcast %cst_6 : f32 to vector<1x256xf32>
    %8 = arith.mulf %6, %7 : vector<1x256xf32>
    %9 = vector.broadcast %8 : vector<1x256xf32> to vector<8x256xf32>
    %10 = arith.addf %5, %9 : vector<8x256xf32>
    %c0_7 = arith.constant 0 : index
    %c0_8 = arith.constant 0 : index
    %11 = vector.load %arg5[%c0_7, %c0_8] : memref<8x256xf32, #tpu.memory_space<vmem>>, vector<8x256xf32>
    tpu.vector_store %arg5[%c0_7, %c0_8], %10 {strides = array<i32>} : memref<8x256xf32, #tpu.memory_space<vmem>>, vector<8x256xf32>,
    return
  }
  func.func @transform_0(%arg0: i32, %arg1: i32) -> (i32, i32) {
    %c0_i32 = arith.constant 0 : i32
    %c0_i32_0 = arith.constant 0 : i32
    return %arg0, %c0_i32 : i32, i32
  }
  func.func @transform_1(%arg0: i32, %arg1: i32) -> (i32, i32) {
    %c0_i32 = arith.constant 0 : i32
    %c0_i32_0 = arith.constant 0 : i32
    return %c0_i32, %arg1 : i32, i32
  }
  func.func @transform_2(%arg0: i32, %arg1: i32) -> (i32, i32) {
    %c0_i32 = arith.constant 0 : i32
    %c0_i32_0 = arith.constant 0 : i32
    return %c0_i32, %arg1 : i32, i32
  }
  func.func @transform_3(%arg0: i32, %arg1: i32) -> (i32, i32) {
    %c0_i32 = arith.constant 0 : i32
    return %arg0, %arg1 : i32, i32
  }
}

</mosaic_0001>

<bundles_post_ra>
// kernel: tpu_custom_call.1
= control target key start
LH: loop header
LB: loop body
LE: loop exit
PB: predicated region body
PF: predicated region fallthrough
CT: control target
= control target key end

     0   :  { %8 = vsyncpa [#allocation4], 0  ;;  %s332_s0 = inlined_call_operand.hbm [shape: f32[8,128], index: 0, kind: input, shape index: {}]   ;;  %s333_s1 = inlined_call_operand.hbm [shape: f32[128,256], index: 1, kind: input, shape index: {}]   ;;  %s334_s2 = inlined_call_operand.hbm [shape: f32[1,256], index: 2, kind: input, shape index: {}]   ;;  %s335_s3 = inlined_call_operand.hbm [shape: f32[8,256], index: 3, kind: output, shape index: {}]  }
   0x1   :  { %9 = vsyncpa [#allocation7], 0  ;;  %s26_s14 = sshll.u32 %s333_s1, 4  ;;  %s27_s14 = int_to_ptr.hbm [resolvable:$true] %s26_s14 }
   0x2   :  { %10 = vsyncpa [#allocation5], 0  ;;  %s289_s15 = smov [#allocation6]   ;;  %s16_s19 = sshll.u32 %s332_s0, 4  ;;  %s17_s19 = int_to_ptr.hbm [resolvable:$true] %s16_s19 }
   0x3   :  { %s28_s16 = sshll.u32 %s289_s15, 4  ;;  %s290_s20 = smov 256   ;;  %s29_s16 = int_to_ptr.vmem [resolvable:$true] %s28_s16 }
   0x4   :  { %s291_s21 = smov 16   ;;  %s292_s22 = smov [#allocation3]  }
   0x5   :  { %34 = dma.hbm_to_vmem [thread:$0]  %s27_s14, 4096, %s29_s16, [#allocation7], %s290_s20, %s290_s20, %s291_s21  }
   0x6   :  { %s18_s23 = sshll.u32 %s292_s22, 4  ;;  %s40_s26 = sshll.u32 %s334_s2, 4  ;;  %s19_s23 = int_to_ptr.vmem [resolvable:$true] %s18_s23  ;;  %s41_s26 = int_to_ptr.hbm [resolvable:$true] %s40_s26 }
   0x7   :  { %21 = dma.hbm_to_vmem [thread:$0]  %s17_s19, 128, %s19_s23, [#allocation4]  }
   0x8   :  { %s293_s1 = smov [#allocation8]  }
   0x9   :  { %s42_s27 = sshll.u32 %s293_s1, 4  ;;  %s43_s27 = int_to_ptr.vmem [resolvable:$true] %s42_s27 }
   0xa   :  { %45 = dma.hbm_to_vmem [thread:$0]  %s41_s26, 32, %s43_s27, [#allocation7]  }
   0xb   :  { %283 = dma.done.wait [#allocation4], 128  }
   0xc   :  { %284 = vsyncadd [#allocation4], 4294967168 }
   0xd   :  { %285 = dma.done.wait [#allocation7], 4128  }
   0xe   :  { %286 = vsyncadd [#allocation7], 4294963168  ;;  %v324_v0 = vld [vmem:[#allocation3] sm:$0xff]  ;;  %v110_v1 = vld [vmem:[#allocation6 + $0xf0] sm:$0xff]  ;;  %s294_s0 = smov [#allocation9]   ;;  %s168_s30 = sshll.u32 %s335_s3, 4  ;;  %s169_s30 = int_to_ptr.hbm [resolvable:$true] %s168_s30 }
   0xf   :  { %v111_v2 = vld [vmem:[#allocation6 + $0xf8] sm:$0xff]  ;;  %v63_v3 = vmul.f32 %v324_v0, %v324_v0  ;;  %119 = vmatpush.msra.mxu0 %v110_v1  ;;  %v108_v4 = vld [vmem:[#allocation6 + $0xe0] sm:$0xff]  ;;  %v109_v5 = vld [vmem:[#allocation6 + $0xe8] sm:$0xff]  ;;  %s166_s2 = sshll.u32 %s294_s0, 4  ;;  %s167_s2 = int_to_ptr.vmem [resolvable:$true] %s166_s2 }
  0x10   :  { %139 = vmatpush.msra.mxu1 %v111_v2  ;;  %v106_v6 = vld [vmem:[#allocation6 + $0xd0] sm:$0xff]  ;;  %v107_v7 = vld [vmem:[#allocation6 + $0xd8] sm:$0xff]  ;;  %v104_v8 = vld [vmem:[#allocation6 + $0xc0] sm:$0xff] }
  0x11   :  { %64 = vadd.xlane.f32.xlu0 %v63_v3  ;;  %120 = vmatpush.msra.mxu0 %v108_v4  ;;  %v105_v9 = vld [vmem:[#allocation6 + $0xc8] sm:$0xff]  ;;  %v102_v10 = vld [vmem:[#allocation6 + $0xb0] sm:$0xff]  ;;  %v103_v11 = vld [vmem:[#allocation6 + $0xb8] sm:$0xff] }
  0x12   :  { %140 = vmatpush.msra.mxu1 %v109_v5  ;;  %v100_v12 = vld [vmem:[#allocation6 + $0xa0] sm:$0xff]  ;;  %v101_v13 = vld [vmem:[#allocation6 + $0xa8] sm:$0xff]  ;;  %v98_v14 = vld [vmem:[#allocation6 + $0x90] sm:$0xff] }
  0x13   :  { %121 = vmatpush.msra.mxu0 %v106_v6  ;;  %v99_v15 = vld [vmem:[#allocation6 + $0x98] sm:$0xff]  ;;  %v96_v16 = vld [vmem:[#allocation6 + $0x80] sm:$0xff]  ;;  %v97_v17 = vld [vmem:[#allocation6 + $0x88] sm:$0xff] }
  0x14   :  { %141 = vmatpush.msra.mxu1 %v107_v7  ;;  %v94_v18 = vld [vmem:[#allocation6 + $0x70] sm:$0xff]  ;;  %v95_v19 = vld [vmem:[#allocation6 + $0x78] sm:$0xff]  ;;  %v92_v20 = vld [vmem:[#allocation6 + $0x60] sm:$0xff] }
  0x15   :  { %122 = vmatpush.msra.mxu0 %v104_v8  ;;  %v93_v21 = vld [vmem:[#allocation6 + $0x68] sm:$0xff]  ;;  %v90_v22 = vld [vmem:[#allocation6 + $0x50] sm:$0xff]  ;;  %v91_v23 = vld [vmem:[#allocation6 + $0x58] sm:$0xff] }
  0x16   :  { %142 = vmatpush.msra.mxu1 %v105_v9  ;;  %v88_v24 = vld [vmem:[#allocation6 + $0x40] sm:$0xff]  ;;  %v89_v25 = vld [vmem:[#allocation6 + $0x48] sm:$0xff]  ;;  %v86_v26 = vld [vmem:[#allocation6 + $0x30] sm:$0xff] }
  0x17   :  { %123 = vmatpush.msra.mxu0 %v102_v10  ;;  %v87_v27 = vld [vmem:[#allocation6 + $0x38] sm:$0xff]  ;;  %v84_v28 = vld [vmem:[#allocation6 + $0x20] sm:$0xff]  ;;  %v85_v29 = vld [vmem:[#allocation6 + $0x28] sm:$0xff] }
  0x18   :  { %143 = vmatpush.msra.mxu1 %v103_v11  ;;  %v82_v30 = vld [vmem:[#allocation6 + $0x10] sm:$0xff]  ;;  %v83_v31 = vld [vmem:[#allocation6 + $0x18] sm:$0xff]  ;;  %v80_v32 = vld [vmem:[#allocation6] sm:$0xff] }
  0x19   :  { %124 = vmatpush.msra.mxu0 %v100_v12  ;;  %v81_v33 = vld [vmem:[#allocation6 + $0x8] sm:$0xff]  ;;  %v112_v44 = vld [vmem:[#allocation8] sm:$0x3] }
  0x1a   :  { %144 = vmatpush.msra.mxu1 %v101_v13  ;;  %v113_v45 = vmul.f32 16.0, %v112_v44 }
  0x1b   :  { %125 = vmatpush.msra.mxu0 %v98_v14 }
  0x1c   :  { %145 = vmatpush.msra.mxu1 %v99_v15  ;;  %v115_v46 = vperm.slane %v113_v45, 0  ;;  %v116_v47 = vperm.slane %v113_v45, 1 }
  0x1d   :  { %126 = vmatpush.msra.mxu0 %v96_v16 }
  0x1e   :  { %146 = vmatpush.msra.mxu1 %v97_v17 }
  0x1f   :  { %127 = vmatpush.msra.mxu0 %v94_v18 }
  0x20   :  { %147 = vmatpush.msra.mxu1 %v95_v19 }
  0x21   :  { %128 = vmatpush.msra.mxu0 %v92_v20 }
  0x22   :  { %148 = vmatpush.msra.mxu1 %v93_v21 }
  0x23   :  { %129 = vmatpush.msra.mxu0 %v90_v22 }
  0x24   :  { %149 = vmatpush.msra.mxu1 %v91_v23 }
  0x25   :  { %130 = vmatpush.msra.mxu0 %v88_v24 }
  0x26   :  { %150 = vmatpush.msra.mxu1 %v89_v25 }
  0x27   :  { %131 = vmatpush.msra.mxu0 %v86_v26 }
  0x28   :  { %151 = vmatpush.msra.mxu1 %v87_v27 }
  0x29   :  { %132 = vmatpush.msra.mxu0 %v84_v28 }
  0x2a   :  { %152 = vmatpush.msra.mxu1 %v85_v29 }
  0x2b   :  { %133 = vmatpush.msra.mxu0 %v82_v30 }
  0x2c   :  { %153 = vmatpush.msra.mxu1 %v83_v31 }
  0x2d   :  { %134 = vmatpush.msra.mxu0 %v80_v32 }
  0x2e   :  { %154 = vmatpush.msra.mxu1 %v81_v33 }
  0x84   :  { %v65_v34 = vpop.xlane.xlu0 %64 }
  0x85   :  { %185 = vrsqrt.f32 %v65_v34  ;;  %vm72_vm1 = vweird.f32 %v65_v34 }
  0x8b   :  { %v186_v35 = vpop.eup %185 }
  0x8c   :  { %v67_v36 = vmul.f32 %v186_v35, %v65_v34  ;;  %vm73_vm0 = vweird.f32 %v186_v35 }
  0x8d   :  { %vm74_vm2 = vmor %vm72_vm1, %vm73_vm0 }
  0x8e   :  { %v68_v37 = vmul.f32 %v186_v35, %v67_v36 }
  0x90   :  { %v69_v38 = vmul.f32 0.5, %v68_v37 }
  0x92   :  { %v70_v39 = vsub.f32 1.5, %v69_v38 }
  0x94   :  { %v71_v40 = vmul.f32 %v186_v35, %v70_v39 }
  0x96   :  { %v75_v41 = vsel %vm74_vm2, %v186_v35, %v71_v40 }
  0x97   :  { %v76_v42 = vmul.f32 16.0, %v75_v41 }
  0x99   :  { %v77_v43 = vmul.f32 %v76_v42, %v324_v0 }
  0x9b   :  { %135 = vmatmul.f32.vlgmr.msra.gmra.mxu0 %v77_v43  ;;  %155 = vmatmul.f32.vlgmr.msra.gmra.mxu1 %v77_v43 }
 0x118   :  { %v136_v48 = vpop.f32.mrf.mxu0  ;;  %v156_v49 = vpop.f32.mrf.mxu1 }
 0x119   :  { %v137_v50 = vadd.f32 %v136_v48, %v115_v46  ;;  %v157_v51 = vadd.f32 %v156_v49, %v116_v47 }
 0x11b   :  { %159 = vst [vmem:[#allocation9] sm:$0xff] %v137_v50 }
 0x11c   :  { %160 = vst [vmem:[#allocation9 + $0x8] sm:$0xff] %v157_v51 }
 0x11d   :  { %171 = dma.vmem_to_hbm [thread:$0]  %s167_s2, 256, %s169_s30, [#allocation5]  }
 0x11e   :  { %287 = dma.done.wait [#allocation5], 256  }
 0x11f   :  { %288 = vsyncadd [#allocation5], 4294967040 }
 0x120   :  { %176 = vsyncpa [#allocation4], 1 }
 0x121   :  { %177 = vsyncpa [#allocation7], 1 }
 0x122   :  { %178 = vsyncpa [#allocation5], 1 }

</bundles_post_ra>
